<compile_context>
chip_gen: v7x
topology: tpu7x:2x2x1
jax: 0.10.0
libtpu: 0.0.40
codegen_flags: <defaults>
</compile_context>

<pallas_src>
import functools

import jax
import jax.numpy as jnp
from jax.experimental import pallas as pl
from jax.experimental.pallas import tpu as pltpu


# ---------------------------------------------------------------------------
# Pallas kernels
# ---------------------------------------------------------------------------
def _shared_gate_kernel(x_ref, w_gu_ref, w_d_ref, gate_w_ref, sh_ref, logits_ref):
    """Fused shared-expert MLP + router logits for one token tile.

    shared = (silu(x @ Wg) * (x @ Wu)) @ Wd      (gate/up merged in w_gu)
    logits = x @ gate_w_t                        (gate_w pre-transposed to [H, E])
    """
    x = x_ref[...]
    gu = jnp.dot(x, w_gu_ref[...], preferred_element_type=jnp.float32)
    inter = gu.shape[-1] // 2
    gate = gu[:, :inter]
    up = gu[:, inter:]
    act = (gate * jax.nn.sigmoid(gate) * up).astype(x.dtype)   # SiluAndMul -> bf16 at MXU input
    sh_ref[...] = jnp.dot(act, w_d_ref[...],
                          preferred_element_type=jnp.float32).astype(sh_ref.dtype)
    logits_ref[...] = jnp.dot(x, gate_w_ref[...],
                              preferred_element_type=jnp.float32)


def _moe_experts_kernel(ids_ref, nact_ref,                       # scalar prefetch (SMEM)
                        shared_ref, x_ref, w13_ref, w2_ref, w_ref,  # inputs
                        o_ref,                                    # output
                        acc_ref):                                 # VMEM scratch
    """Routed experts. grid = (token_tiles, expert_slots); slot axis is the
    reduction axis.  Slot s processes real expert ids_ref[s]; slots past
    nact_ref[0] are padded with a repeated id (DMA elided) and skipped."""
    s = pl.program_id(1)

    @pl.when(s == 0)
    def _():
        # Fold the shared-expert output into the accumulator (saves an extra
        # [T, H] HBM round trip + elementwise add after the kernel).
        acc_ref[...] = shared_ref[...].astype(jnp.float32)

    @pl.when(s < nact_ref[0])
    def _():
        x = x_ref[...]
        gu = jnp.dot(x, w13_ref[0], preferred_element_type=jnp.float32)
        inter = gu.shape[-1] // 2
        gate = gu[:, :inter]
        up = gu[:, inter:]
        act = (gate * jax.nn.sigmoid(gate) * up).astype(x.dtype)
        y = jnp.dot(act, w2_ref[0], preferred_element_type=jnp.float32)  # [TM, H]
        # w_ref[0] is the per-token routing weight column [TM, 1], already
        # scaled by routed_scaling_factor.
        acc_ref[...] += y * w_ref[0]

    @pl.when(s == pl.num_programs(1) - 1)
    def _():
        o_ref[...] = acc_ref[...].astype(o_ref.dtype)


# ---------------------------------------------------------------------------
# Wrappers
# ---------------------------------------------------------------------------
_VMEM_LIMIT = 48 * 1024 * 1024  # safe on v5e/v6e (128 MiB) and v7x (64 MiB)


def shared_and_gate(x, w_gate_up, w_down, gate_w_t, tm):
    T, H = x.shape
    E = gate_w_t.shape[1]
    # TODO(synk): at production shapes (H=5120, SHARED_I=3072) the shared
    # gate_up / down weights need an intermediate-dim (K) tile grid axis to
    # stay inside v7x's 64 MiB VMEM; whole-weight blocks are fine at demo size.
    return pl.pallas_call(
        _shared_gate_kernel,
        out_shape=(jax.ShapeDtypeStruct((T, H), x.dtype),
                   jax.ShapeDtypeStruct((T, E), jnp.float32)),
        grid_spec=pltpu.PrefetchScalarGridSpec(
            num_scalar_prefetch=0,
            grid=(T // tm,),
            in_specs=[
                pl.BlockSpec((tm, H), lambda t: (t, 0)),
                pl.BlockSpec(w_gate_up.shape, lambda t: (0, 0)),
                pl.BlockSpec(w_down.shape, lambda t: (0, 0)),
                pl.BlockSpec(gate_w_t.shape, lambda t: (0, 0)),
            ],
            out_specs=[
                pl.BlockSpec((tm, H), lambda t: (t, 0)),
                pl.BlockSpec((tm, E), lambda t: (t, 0)),
            ],
        ),
        compiler_params=pltpu.CompilerParams(
            dimension_semantics=("parallel",),
            vmem_limit_bytes=_VMEM_LIMIT),
    )(x, w_gate_up, w_down, gate_w_t)


def routed_experts_sparse(x, shared_out, w13, w2, dense_w_et1, active_ids,
                          num_active, tm):
    T, H = x.shape
    E, _, two_i = w13.shape
    I = two_i // 2
    S = active_ids.shape[0]   # static upper bound on active experts
    # TODO(synk): at production shapes (H=5120, I=1536) the per-expert
    # w13/w2 blocks need intermediate-dim tiling (extra inner grid axis) to
    # fit v7x's 64 MiB VMEM when double-buffered.
    return pl.pallas_call(
        _moe_experts_kernel,
        out_shape=jax.ShapeDtypeStruct((T, H), x.dtype),
        grid_spec=pltpu.PrefetchScalarGridSpec(
            num_scalar_prefetch=2,
            grid=(T // tm, S),
            in_specs=[
                pl.BlockSpec((tm, H), lambda t, s, ids, na: (t, 0)),      # shared_out
                pl.BlockSpec((tm, H), lambda t, s, ids, na: (t, 0)),      # x
                pl.BlockSpec((1, H, two_i),
                             lambda t, s, ids, na: (ids[s], 0, 0)),       # w13[expert]
                pl.BlockSpec((1, I, H),
                             lambda t, s, ids, na: (ids[s], 0, 0)),       # w2[expert]
                pl.BlockSpec((1, tm, 1),
                             lambda t, s, ids, na: (ids[s], t, 0)),       # routing col
            ],
            out_specs=pl.BlockSpec((tm, H), lambda t, s, ids, na: (t, 0)),
            scratch_shapes=[pltpu.VMEM((tm, H), jnp.float32)],
        ),
        compiler_params=pltpu.CompilerParams(
            dimension_semantics=("parallel", "arbitrary"),
            vmem_limit_bytes=_VMEM_LIMIT),
    )(active_ids, num_active, shared_out, x, w13, w2, dense_w_et1)


# ---------------------------------------------------------------------------
# Routing glue (plain JAX)
# ---------------------------------------------------------------------------
def grouped_topk_routing(logits, top_k, n_group, topk_group, renormalize):
    """sglang grouped_topk (softmax scoring, no correction bias)."""
    T, E = logits.shape
    scores = jax.nn.softmax(logits.astype(jnp.float32), axis=-1)
    group_scores = scores.reshape(T, n_group, E // n_group).max(axis=-1)     # [T, G]
    group_idx = jax.lax.top_k(group_scores, topk_group)[1]                   # [T, kg]
    group_mask = jnp.zeros((T, n_group), jnp.float32).at[
        jnp.arange(T)[:, None], group_idx].set(1.0)
    score_mask = jnp.repeat(group_mask, E // n_group, axis=1)                # [T, E]
    masked = jnp.where(score_mask > 0, scores, 0.0)
    topk_w, topk_ids = jax.lax.top_k(masked, top_k)
    if renormalize:
        topk_w = topk_w / (jnp.sum(topk_w, axis=-1, keepdims=True) + 1e-20)
    return topk_w, topk_ids


def build_expert_dispatch(topk_w, topk_ids, num_experts, scaling_factor):
    """Dense [E, T, 1] scaled routing weights + compacted active-expert list."""
    T, K = topk_ids.shape
    E = num_experts
    dense_te = jnp.zeros((T, E), jnp.float32).at[
        jnp.arange(T)[:, None], topk_ids].set(topk_w * scaling_factor)
    dense_et1 = dense_te.T[:, :, None]                                       # [E, T, 1]

    counts = jnp.zeros((E,), jnp.int32).at[topk_ids.reshape(-1)].add(1)
    active = counts > 0
    num_active = jnp.sum(active.astype(jnp.int32))
    order = jnp.argsort((~active).astype(jnp.int32)).astype(jnp.int32)       # actives first
    num_slots = min(E, T * K)                                                # static bound
    ids = order[:num_slots]
    # Pad unused slots with the last active id so their block index repeats
    # (pipeline skips the redundant weight DMA); compute is skipped by pl.when.
    pad_id = ids[jnp.clip(num_active - 1, 0, num_slots - 1)]
    slot = jnp.arange(num_slots, dtype=jnp.int32)
    ids = jnp.where(slot < num_active, ids, pad_id)
    return dense_et1, ids, num_active.astype(jnp.int32).reshape((1,))


# ---------------------------------------------------------------------------
# Top-level forward (forward_normal path, tp_size=1)
# ---------------------------------------------------------------------------
@functools.partial(jax.jit, static_argnames=("top_k", "n_group", "topk_group",
                                             "renormalize", "routed_scaling_factor"))
def deepseek_v2_moe_forward(hidden_states, params, *, top_k, n_group,
                            topk_group, renormalize, routed_scaling_factor):
    T, H = hidden_states.shape
    tm = T if T <= 128 else 128
    pad = (-T) % tm
    x = hidden_states
    if pad:
        x = jnp.pad(x, ((0, pad), (0, 0)))

    # shared_experts(hidden_states) + gate(hidden_states), fused
    shared_out, logits = shared_and_gate(
        x, params["shared_w_gate_up"], params["shared_w_down"],
        params["gate_w_t"], tm)

    # select_experts / grouped top-k (glue)
    topk_w, topk_ids = grouped_topk_routing(logits, top_k, n_group,
                                            topk_group, renormalize)
    E = params["expert_w13"].shape[0]
    dense_et1, active_ids, num_active = build_expert_dispatch(
        topk_w, topk_ids, E, routed_scaling_factor)

    # experts(...) * routed_scaling_factor + shared_output  (fused in kernel)
    out = routed_experts_sparse(x, shared_out, params["expert_w13"],
                                params["expert_w2"], dense_et1,
                                active_ids, num_active, tm)
    if pad:
        out = out[:T]
    return out
    # TODO(synk): topk_method='noaux_tc' (e_score_correction_bias / sigmoid
    # scoring) and tensor-parallel all-reduce are not modeled (tp_size=1).


# ---------------------------------------------------------------------------
# Pure-JAX reference (correctness check)
# ---------------------------------------------------------------------------
def reference_forward(hidden_states, params, *, top_k, n_group, topk_group,
                      renormalize, routed_scaling_factor):
    x32 = hidden_states.astype(jnp.float32)

    def mlp(xf, w_gu, w_d):
        gu = xf @ w_gu.astype(jnp.float32)
        i = gu.shape[-1] // 2
        return (jax.nn.silu(gu[:, :i]) * gu[:, i:]) @ w_d.astype(jnp.float32)

    shared = mlp(x32, params["shared_w_gate_up"], params["shared_w_down"])
    # gate with the same numerics as the kernel (bf16 inputs, f32 accumulate)
    # so routing decisions match exactly.
    logits = jnp.dot(hidden_states, params["gate_w_t"],
                     preferred_element_type=jnp.float32)
    topk_w, topk_ids = grouped_topk_routing(logits, top_k, n_group,
                                            topk_group, renormalize)
    T = hidden_states.shape[0]
    E = params["expert_w13"].shape[0]
    dense = jnp.zeros((T, E), jnp.float32).at[
        jnp.arange(T)[:, None], topk_ids].set(topk_w)
    moe = jnp.zeros_like(x32)
    for e in range(E):
        y = mlp(x32, params["expert_w13"][e], params["expert_w2"][e])
        moe = moe + y * dense[:, e:e + 1]
    return moe * routed_scaling_factor + shared


# ---------------------------------------------------------------------------
if __name__ == "__main__":
    # Small DeepseekV2 MoE config (forward_normal path, tp_size=1, no deepep).
    T = 8                      # num tokens
    H = 64                     # hidden_size
    E = 8                      # n_routed_experts
    I = 32                     # moe_intermediate_size
    N_SHARED = 2               # n_shared_experts
    SHARED_I = I * N_SHARED    # shared intermediate_size
    TOP_K = 2                  # num_experts_per_tok
    N_GROUP = 4                # n_group
    TOPK_GROUP = 2             # topk_group
    RENORM = True              # norm_topk_prob
    SCALE = 1.5                # routed_scaling_factor

    key = jax.random.PRNGKey(0)
    ks = jax.random.split(key, 6)
    scale = 0.05
    # Weights stored bf16 (native MXU input); gate weight pre-transposed [H, E].
    gate_w = scale * jax.random.normal(ks[0], (E, H), jnp.float32)
    params = {
        "gate_w_t": gate_w.T.astype(jnp.bfloat16),                               # [H, E]
        "shared_w_gate_up": (scale * jax.random.normal(
            ks[1], (H, 2 * SHARED_I), jnp.float32)).astype(jnp.bfloat16),        # [H, 2*SI]
        "shared_w_down": (scale * jax.random.normal(
            ks[2], (SHARED_I, H), jnp.float32)).astype(jnp.bfloat16),            # [SI, H]
        "expert_w13": (scale * jax.random.normal(
            ks[3], (E, H, 2 * I), jnp.float32)).astype(jnp.bfloat16),            # [E, H, 2I]
        "expert_w2": (scale * jax.random.normal(
            ks[4], (E, I, H), jnp.float32)).astype(jnp.bfloat16),                # [E, I, H]
    }
    hidden_states = jax.random.normal(ks[5], (T, H), jnp.float32).astype(jnp.bfloat16)

    out = deepseek_v2_moe_forward(
        hidden_states, params,
        top_k=TOP_K, n_group=N_GROUP, topk_group=TOPK_GROUP,
        renormalize=RENORM, routed_scaling_factor=SCALE)
    out = jax.block_until_ready(out)

    ref = reference_forward(
        hidden_states, params,
        top_k=TOP_K, n_group=N_GROUP, topk_group=TOPK_GROUP,
        renormalize=RENORM, routed_scaling_factor=SCALE)

    assert out.shape == (T, H)
    assert jnp.allclose(out.astype(jnp.float32), ref, rtol=2e-2, atol=2e-2), \
        "mismatch vs reference"
    print("KERNEL_OK")
</pallas_src>

<mosaic_0001>
module attributes {stable_mosaic.version = 11 : i64} {
  func.func private @main(%arg0: i32) attributes {dimension_semantics = [#tpu.dimension_semantics<core_parallel>], iteration_bounds = array<i64: 2>, tpu.core_type = #tpu.core_type<sc_scalar_subcore>, window_params = []} {
    return
  }
}

module attributes {stable_mosaic.version = 11 : i64} {
  func.func private @main(%arg0: i32) attributes {dimension_semantics = [#tpu.dimension_semantics<core_parallel>], iteration_bounds = array<i64: 2>, tpu.core_type = #tpu.core_type<sc_scalar_subcore>, window_params = []} {
    return
  }
}

module attributes {stable_mosaic.version = 11 : i64} {
  func.func @_shared_gate_kernel(%arg0: i32, %arg1: memref<8x64xbf16, #tpu.memory_space<vmem>>, %arg2: memref<64x128xbf16, #tpu.memory_space<vmem>>, %arg3: memref<64x64xbf16, #tpu.memory_space<vmem>>, %arg4: memref<64x8xbf16, #tpu.memory_space<vmem>>, %arg5: memref<8x64xbf16, #tpu.memory_space<vmem>>, %arg6: memref<8x8xf32, #tpu.memory_space<vmem>>) attributes {dimension_semantics = [#tpu.dimension_semantics<parallel>], iteration_bounds = array<i64: 1>, scalar_prefetch = 0 : i64, scratch_operands = 0 : i64, tpu.core_type = #tpu.core_type<tc>, window_params = [{transform_indices = @transform_0, window_bounds = array<i64: 8, 64>}, {pipeline_mode = #tpu.pipeline_mode<synchronous>, transform_indices = @transform_1, window_bounds = array<i64: 64, 128>}, {pipeline_mode = #tpu.pipeline_mode<synchronous>, transform_indices = @transform_2, window_bounds = array<i64: 64, 64>}, {pipeline_mode = #tpu.pipeline_mode<synchronous>, transform_indices = @transform_3, window_bounds = array<i64: 64, 8>}, {transform_indices = @transform_4, window_bounds = array<i64: 8, 64>}, {transform_indices = @transform_5, window_bounds = array<i64: 8, 8>}]} {
    %c0 = arith.constant 0 : index
    %c0_0 = arith.constant 0 : index
    %0 = vector.load %arg1[%c0, %c0_0] : memref<8x64xbf16, #tpu.memory_space<vmem>>, vector<8x64xbf16>
    %c0_1 = arith.constant 0 : index
    %c0_2 = arith.constant 0 : index
    %1 = vector.load %arg2[%c0_1, %c0_2] : memref<64x128xbf16, #tpu.memory_space<vmem>>, vector<64x128xbf16>
    %cst = arith.constant dense<0.000000e+00> : vector<8x128xf32>
    %2 = tpu.matmul %0, %1, %cst {dimension_numbers = #tpu.dot_dimension_numbers<[1], [0], [0], [1], [0, 0, 1, 1], [], []>} : vector<8x64xbf16>, vector<64x128xbf16>, vector<8x128xf32> -> vector<8x128xf32>
    %3 = vector.extract_strided_slice %2 {offsets = [0, 0], sizes = [8, 64], strides = [1, 1]} : vector<8x128xf32> to vector<8x64xf32>
    %4 = vector.extract_strided_slice %2 {offsets = [0, 64], sizes = [8, 64], strides = [1, 1]} : vector<8x128xf32> to vector<8x64xf32>
    %5 = arith.negf %3 : vector<8x64xf32>
    %6 = math.exp %5 : vector<8x64xf32>
    %cst_3 = arith.constant 1.000000e+00 : f32
    %7 = vector.broadcast %cst_3 : f32 to vector<8x64xf32>
    %8 = arith.addf %7, %6 : vector<8x64xf32>
    %9 = arith.divf %7, %8 : vector<8x64xf32>
    %10 = arith.mulf %3, %9 : vector<8x64xf32>
    %11 = arith.mulf %10, %4 : vector<8x64xf32>
    %12 = arith.truncf %11 : vector<8x64xf32> to vector<8x64xbf16>
    %c0_4 = arith.constant 0 : index
    %c0_5 = arith.constant 0 : index
    %13 = vector.load %arg3[%c0_4, %c0_5] : memref<64x64xbf16, #tpu.memory_space<vmem>>, vector<64x64xbf16>
    %cst_6 = arith.constant dense<0.000000e+00> : vector<8x64xf32>
    %14 = tpu.matmul %12, %13, %cst_6 {dimension_numbers = #tpu.dot_dimension_numbers<[1], [0], [0], [1], [0, 0, 1, 1], [], []>} : vector<8x64xbf16>, vector<64x64xbf16>, vector<8x64xf32> -> vector<8x64xf32>
    %15 = arith.truncf %14 : vector<8x64xf32> to vector<8x64xbf16>
    %c0_7 = arith.constant 0 : index
    %c0_8 = arith.constant 0 : index
    %16 = vector.load %arg5[%c0_7, %c0_8] : memref<8x64xbf16, #tpu.memory_space<vmem>>, vector<8x64xbf16>
    tpu.vector_store %arg5[%c0_7, %c0_8], %15 {strides = array<i32>} : memref<8x64xbf16, #tpu.memory_space<vmem>>, vector<8x64xbf16>,
    %c0_9 = arith.constant 0 : index
    %c0_10 = arith.constant 0 : index
    %17 = vector.load %arg4[%c0_9, %c0_10] : memref<64x8xbf16, #tpu.memory_space<vmem>>, vector<64x8xbf16>
    %cst_11 = arith.constant dense<0.000000e+00> : vector<8x8xf32>
    %18 = tpu.matmul %0, %17, %cst_11 {dimension_numbers = #tpu.dot_dimension_numbers<[1], [0], [0], [1], [0, 0, 1, 1], [], []>} : vector<8x64xbf16>, vector<64x8xbf16>, vector<8x8xf32> -> vector<8x8xf32>
    %c0_12 = arith.constant 0 : index
    %c0_13 = arith.constant 0 : index
    %19 = vector.load %arg6[%c0_12, %c0_13] : memref<8x8xf32, #tpu.memory_space<vmem>>, vector<8x8xf32>
    tpu.vector_store %arg6[%c0_12, %c0_13], %18 {strides = array<i32>} : memref<8x8xf32, #tpu.memory_space<vmem>>, vector<8x8xf32>,
    return
  }
  func.func @transform_0(%arg0: i32) -> (i32, i32) {
    %c0_i32 = arith.constant 0 : i32
    %c0_i32_0 = arith.constant 0 : i32
    return %arg0, %c0_i32 : i32, i32
  }
  func.func @transform_1(%arg0: i32) -> (i32, i32) {
    %c0_i32 = arith.constant 0 : i32
    %c0_i32_0 = arith.constant 0 : i32
    %c0_i32_1 = arith.constant 0 : i32
    return %c0_i32, %c0_i32_0 : i32, i32
  }
  func.func @transform_2(%arg0: i32) -> (i32, i32) {
    %c0_i32 = arith.constant 0 : i32
    %c0_i32_0 = arith.constant 0 : i32
    %c0_i32_1 = arith.constant 0 : i32
    return %c0_i32, %c0_i32_0 : i32, i32
  }
  func.func @transform_3(%arg0: i32) -> (i32, i32) {
    %c0_i32 = arith.constant 0 : i32
    %c0_i32_0 = arith.constant 0 : i32
    %c0_i32_1 = arith.constant 0 : i32
    return %c0_i32, %c0_i32_0 : i32, i32
  }
  func.func @transform_4(%arg0: i32) -> (i32, i32) {
    %c0_i32 = arith.constant 0 : i32
    %c0_i32_0 = arith.constant 0 : i32
    return %arg0, %c0_i32 : i32, i32
  }
  func.func @transform_5(%arg0: i32) -> (i32, i32) {
    %c0_i32 = arith.constant 0 : i32
    %c0_i32_0 = arith.constant 0 : i32
    return %arg0, %c0_i32 : i32, i32
  }
}

module attributes {stable_mosaic.version = 11 : i64} {
  func.func @_moe_experts_kernel(%arg0: i32, %arg1: i32, %arg2: memref<8xi32, #tpu.memory_space<smem>>, %arg3: memref<1xi32, #tpu.memory_space<smem>>, %arg4: memref<8x64xbf16, #tpu.memory_space<vmem>>, %arg5: memref<8x64xbf16, #tpu.memory_space<vmem>>, %arg6: memref<1x64x64xbf16, #tpu.memory_space<vmem>>, %arg7: memref<1x32x64xbf16, #tpu.memory_space<vmem>>, %arg8: memref<1x8x1xf32, #tpu.memory_space<vmem>>, %arg9: memref<8x64xbf16, #tpu.memory_space<vmem>>, %arg10: memref<8x64xf32, #tpu.memory_space<vmem>>) attributes {dimension_semantics = [#tpu.dimension_semantics<parallel>, #tpu.dimension_semantics<arbitrary>], iteration_bounds = array<i64: 1, 8>, scalar_prefetch = 2 : i64, scratch_operands = 1 : i64, tpu.core_type = #tpu.core_type<tc>, window_params = [{transform_indices = @transform_0, window_bounds = array<i64: 8, 64>}, {transform_indices = @transform_1, window_bounds = array<i64: 8, 64>}, {transform_indices = @transform_2, window_bounds = array<i64: 1, 64, 64>}, {transform_indices = @transform_3, window_bounds = array<i64: 1, 32, 64>}, {transform_indices = @transform_4, window_bounds = array<i64: 1, 8, 1>}, {transform_indices = @transform_5, window_bounds = array<i64: 8, 64>}]} {
    %c0_i32 = arith.constant 0 : i32
    %0 = arith.cmpi eq, %arg1, %c0_i32 : i32
    %1 = arith.extui %0 : i1 to i32
    %c0_i32_0 = arith.constant 0 : i32
    %2 = arith.cmpi ne, %1, %c0_i32_0 : i32
    scf.if %2 {
      %c0_3 = arith.constant 0 : index
      %c0_4 = arith.constant 0 : index
      %10 = vector.load %arg4[%c0_3, %c0_4] : memref<8x64xbf16, #tpu.memory_space<vmem>>, vector<8x64xbf16>
      %11 = arith.extf %10 : vector<8x64xbf16> to vector<8x64xf32>
      %c0_5 = arith.constant 0 : index
      %c0_6 = arith.constant 0 : index
      %12 = vector.load %arg10[%c0_5, %c0_6] : memref<8x64xf32, #tpu.memory_space<vmem>>, vector<8x64xf32>
      tpu.vector_store %arg10[%c0_5, %c0_6], %11 {strides = array<i32>} : memref<8x64xf32, #tpu.memory_space<vmem>>, vector<8x64xf32>,
    } else {
    }
    %c0 = arith.constant 0 : index
    %3 = memref.load %arg3[%c0] : memref<1xi32, #tpu.memory_space<smem>>
    %4 = arith.cmpi slt, %arg1, %3 : i32
    %5 = arith.extui %4 : i1 to i32
    %c0_i32_1 = arith.constant 0 : i32
    %6 = arith.cmpi ne, %5, %c0_i32_1 : i32
    scf.if %6 {
      %c0_3 = arith.constant 0 : index
      %c0_4 = arith.constant 0 : index
      %10 = vector.load %arg5[%c0_3, %c0_4] : memref<8x64xbf16, #tpu.memory_space<vmem>>, vector<8x64xbf16>
      %c0_5 = arith.constant 0 : index
      %c0_6 = arith.constant 0 : index
      %c0_7 = arith.constant 0 : index
      %11 = vector.load %arg6[%c0_5, %c0_6, %c0_7] : memref<1x64x64xbf16, #tpu.memory_space<vmem>>, vector<1x64x64xbf16>
      %12 = vector.shape_cast %11 : vector<1x64x64xbf16> to vector<64x64xbf16>
      %cst = arith.constant dense<0.000000e+00> : vector<8x64xf32>
      %13 = tpu.matmul %10, %12, %cst {dimension_numbers = #tpu.dot_dimension_numbers<[1], [0], [0], [1], [0, 0, 1, 1], [], []>} : vector<8x64xbf16>, vector<64x64xbf16>, vector<8x64xf32> -> vector<8x64xf32>
      %14 = vector.extract_strided_slice %13 {offsets = [0, 0], sizes = [8, 32], strides = [1, 1]} : vector<8x64xf32> to vector<8x32xf32>
      %15 = vector.extract_strided_slice %13 {offsets = [0, 32], sizes = [8, 32], strides = [1, 1]} : vector<8x64xf32> to vector<8x32xf32>
      %16 = arith.negf %14 : vector<8x32xf32>
      %17 = math.exp %16 : vector<8x32xf32>
      %cst_8 = arith.constant 1.000000e+00 : f32
      %18 = vector.broadcast %cst_8 : f32 to vector<8x32xf32>
      %19 = arith.addf %18, %17 : vector<8x32xf32>
      %20 = arith.divf %18, %19 : vector<8x32xf32>
      %21 = arith.mulf %14, %20 : vector<8x32xf32>
      %22 = arith.mulf %21, %15 : vector<8x32xf32>
      %23 = arith.truncf %22 : vector<8x32xf32> to vector<8x32xbf16>
      %c0_9 = arith.constant 0 : index
      %c0_10 = arith.constant 0 : index
      %c0_11 = arith.constant 0 : index
      %24 = vector.load %arg7[%c0_9, %c0_10, %c0_11] : memref<1x32x64xbf16, #tpu.memory_space<vmem>>, vector<1x32x64xbf16>
      %25 = vector.shape_cast %24 : vector<1x32x64xbf16> to vector<32x64xbf16>
      %cst_12 = arith.constant dense<0.000000e+00> : vector<8x64xf32>
      %26 = tpu.matmul %23, %25, %cst_12 {dimension_numbers = #tpu.dot_dimension_numbers<[1], [0], [0], [1], [0, 0, 1, 1], [], []>} : vector<8x32xbf16>, vector<32x64xbf16>, vector<8x64xf32> -> vector<8x64xf32>
      %c0_13 = arith.constant 0 : index
      %c0_14 = arith.constant 0 : index
      %27 = vector.load %arg10[%c0_13, %c0_14] : memref<8x64xf32, #tpu.memory_space<vmem>>, vector<8x64xf32>
      %c0_15 = arith.constant 0 : index
      %c0_16 = arith.constant 0 : index
      %c0_17 = arith.constant 0 : index
      %28 = vector.load %arg8[%c0_15, %c0_16, %c0_17] : memref<1x8x1xf32, #tpu.memory_space<vmem>>, vector<1x8x1xf32>
      %29 = vector.shape_cast %28 : vector<1x8x1xf32> to vector<8x1xf32>
      %30 = vector.broadcast %29 : vector<8x1xf32> to vector<8x64xf32>
      %31 = arith.mulf %26, %30 : vector<8x64xf32>
      %32 = arith.addf %27, %31 : vector<8x64xf32>
      %c0_18 = arith.constant 0 : index
      %c0_19 = arith.constant 0 : index
      %33 = vector.load %arg10[%c0_18, %c0_19] : memref<8x64xf32, #tpu.memory_space<vmem>>, vector<8x64xf32>
      tpu.vector_store %arg10[%c0_18, %c0_19], %32 {strides = array<i32>} : memref<8x64xf32, #tpu.memory_space<vmem>>, vector<8x64xf32>,
    } else {
    }
    %c7_i32 = arith.constant 7 : i32
    %7 = arith.cmpi eq, %arg1, %c7_i32 : i32
    %8 = arith.extui %7 : i1 to i32
    %c0_i32_2 = arith.constant 0 : i32
    %9 = arith.cmpi ne, %8, %c0_i32_2 : i32
    scf.if %9 {
      %c0_3 = arith.constant 0 : index
      %c0_4 = arith.constant 0 : index
      %10 = vector.load %arg10[%c0_3, %c0_4] : memref<8x64xf32, #tpu.memory_space<vmem>>, vector<8x64xf32>
      %11 = arith.truncf %10 : vector<8x64xf32> to vector<8x64xbf16>
      %c0_5 = arith.constant 0 : index
      %c0_6 = arith.constant 0 : index
      %12 = vector.load %arg9[%c0_5, %c0_6] : memref<8x64xbf16, #tpu.memory_space<vmem>>, vector<8x64xbf16>
      tpu.vector_store %arg9[%c0_5, %c0_6], %11 {strides = array<i32>} : memref<8x64xbf16, #tpu.memory_space<vmem>>, vector<8x64xbf16>,
    } else {
    }
    return
  }
  func.func @transform_0(%arg0: i32, %arg1: i32, %arg2: memref<8xi32, #tpu.memory_space<smem>>, %arg3: memref<1xi32, #tpu.memory_space<smem>>) -> (i32, i32) {
    %c0_i32 = arith.constant 0 : i32
    %c0_i32_0 = arith.constant 0 : i32
    return %arg0, %c0_i32 : i32, i32
  }
  func.func @transform_1(%arg0: i32, %arg1: i32, %arg2: memref<8xi32, #tpu.memory_space<smem>>, %arg3: memref<1xi32, #tpu.memory_space<smem>>) -> (i32, i32) {
    %c0_i32 = arith.constant 0 : i32
    %c0_i32_0 = arith.constant 0 : i32
    return %arg0, %c0_i32 : i32, i32
  }
  func.func @transform_2(%arg0: i32, %arg1: i32, %arg2: memref<8xi32, #tpu.memory_space<smem>>, %arg3: memref<1xi32, #tpu.memory_space<smem>>) -> (i32, i32, i32) {
    %0 = arith.index_cast %arg1 : i32 to index
    %1 = memref.load %arg2[%0] : memref<8xi32, #tpu.memory_space<smem>>
    %c0_i32 = arith.constant 0 : i32
    %c0_i32_0 = arith.constant 0 : i32
    %c0_i32_1 = arith.constant 0 : i32
    return %1, %c0_i32, %c0_i32_0 : i32, i32, i32
  }
  func.func @transform_3(%arg0: i32, %arg1: i32, %arg2: memref<8xi32, #tpu.memory_space<smem>>, %arg3: memref<1xi32, #tpu.memory_space<smem>>) -> (i32, i32, i32) {
    %0 = arith.index_cast %arg1 : i32 to index
    %1 = memref.load %arg2[%0] : memref<8xi32, #tpu.memory_space<smem>>
    %c0_i32 = arith.constant 0 : i32
    %c0_i32_0 = arith.constant 0 : i32
    %c0_i32_1 = arith.constant 0 : i32
    return %1, %c0_i32, %c0_i32_0 : i32, i32, i32
  }
  func.func @transform_4(%arg0: i32, %arg1: i32, %arg2: memref<8xi32, #tpu.memory_space<smem>>, %arg3: memref<1xi32, #tpu.memory_space<smem>>) -> (i32, i32, i32) {
    %0 = arith.index_cast %arg1 : i32 to index
    %1 = memref.load %arg2[%0] : memref<8xi32, #tpu.memory_space<smem>>
    %c0_i32 = arith.constant 0 : i32
    %c0_i32_0 = arith.constant 0 : i32
    return %1, %arg0, %c0_i32 : i32, i32, i32
  }
  func.func @transform_5(%arg0: i32, %arg1: i32, %arg2: memref<8xi32, #tpu.memory_space<smem>>, %arg3: memref<1xi32, #tpu.memory_space<smem>>) -> (i32, i32) {
    %c0_i32 = arith.constant 0 : i32
    %c0_i32_0 = arith.constant 0 : i32
    return %arg0, %c0_i32 : i32, i32
  }
}

</mosaic_0001>

<bundles_post_ra>
// kernel: deepseek_v2_moe_forward.2
= control target key start
LH: loop header
LB: loop body
LE: loop exit
PB: predicated region body
PF: predicated region fallthrough
CT: control target
= control target key end

     0   :  { %11 = vsyncpa [#allocation3], 0  ;;  %s397_s18 = smov [#allocation2]   ;;  %s486_s0 = inlined_call_operand.vmem [shape: bf16[8,64], index: 0, kind: input, shape index: {}]   ;;  %s487_s1 = inlined_call_operand.vmem [shape: bf16[64,128], index: 1, kind: input, shape index: {}]   ;;  %s488_s2 = inlined_call_operand.hbm [shape: bf16[64,64], index: 2, kind: input, shape index: {}]   ;;  %s489_s3 = inlined_call_operand.vmem [shape: bf16[64,8], index: 3, kind: input, shape index: {}]   ;;  %s490_s4 = inlined_call_operand.vmem [shape: bf16[8,64], index: 4, kind: output, shape index: {0}]   ;;  %s491_s5 = inlined_call_operand.vmem [shape: f32[8,8], index: 5, kind: output, shape index: {1}]  }
   0x1   :  { %s21_s19 = sshll.u32 %s397_s18, 4  ;;  %s373_s22 = scalar_lea.hbm %s488_s2, 512  ;;  %s22_s19 = int_to_ptr.vmem [resolvable:$true] %s21_s19 }
   0x2   :  { %p374_p0 = scmp.ne.s32.totalorder %s488_s2, %s373_s22  ;;  %p377_p1 = scmp.lt.u32.totalorder %s373_s22, %s488_s2 }
   0x4   :  { %p379_p2 = pnand %p377_p1, %p374_p0 }
   0x6   :  { %382 = shalt.err (!%p379_p2)
}
   0x7   :  { %s383_s27 = scalar_lea.vmem %s22_s19, 512  ;;  %p388_p4 = scmp.lt.s32.totalorder %s22_s19, %s22_s19 }
   0x8   :  { %p384_p3 = scmp.ne.s32.totalorder %s22_s19, %s383_s27  ;;  %p389_p5 = scmp.lt.s32.totalorder %s383_s27, %s383_s27 }
   0xa   :  { %p390_p6 = por %p389_p5, %p388_p4 }
   0xc   :  { %p391_p7 = pnand %p390_p6, %p384_p3 }
   0xe   :  { %394 = shalt.err (!%p391_p7)
}
   0xf   :  { %s398_s28 = smov 64   ;;  %s399_s29 = smov 4  }
  0x10   :  { %27 = dma.hbm_to_vmem [thread:$0]  %s488_s2, 512, %s22_s19, [#allocation3], %s398_s28, %s398_s28, %s399_s29  }
  0x11   :  { %395 = dma.done.wait [#allocation3], 512  }
  0x12   :  { %396 = vsyncadd [#allocation3], 4294966784  ;;  %v400_v0 = vmov 0.0   ;;  %vm401_vm0 = vmmov 0   ;;  %v357_v1 = vld [vmem:[%s487_s1] sm:$0xff]   ;;  %v358_v2 = vld [vmem:[%s487_s1 + $0x8] sm:$0xff]  }
  0x13   :  { %316 = vmatprep.subr.bf16.mxu0 %v400_v0  ;;  %324 = vmatprep.mubr.msk.bf16.mxu0 %vm401_vm0, %v400_v0  ;;  %v359_v3 = vld [vmem:[%s487_s1 + $0x10] sm:$0xff]   ;;  %v360_v4 = vld [vmem:[%s487_s1 + $0x18] sm:$0xff]   ;;  %v34_v5 = vld [vmem:[%s486_s0] sm:$0xf]  ;;  %vm67_vm1 = vcmask 523264   ;;  %vm274_vm2 = vcmask 64512  }
  0x14   :  { %328 = vmatprep.subr.bf16.mxu1 %v400_v0  ;;  %336 = vmatprep.mubr.msk.bf16.mxu1 %vm401_vm0, %v400_v0  ;;  %v361_v6 = vld [vmem:[%s489_s3] sm:$0xff]   ;;  %v363_v8 = vld [vmem:[%s489_s3 + $0x8] sm:$0xff]   ;;  %v365_v10 = vld [vmem:[%s489_s3 + $0x10] sm:$0xff]   ;;  %vm200_vm3 = vcmask 519168  }
  0x15   :  { %317 = vmatpush3.bf16.msra.mxu0 %v357_v1  ;;  %v362_v7 = vld [vmem:[#allocation2] sm:$0xff]   ;;  %v364_v9 = vld [vmem:[#allocation2 + $0x8] sm:$0xff]   ;;  %v366_v11 = vld [vmem:[#allocation2 + $0x10] sm:$0xff]  }
  0x16   :  { %318 = vmatprep.subr.bf16.mxu0 %v400_v0  ;;  %329 = vmatpush3.bf16.msra.mxu1 %v362_v7  ;;  %v367_v12 = vld [vmem:[%s489_s3 + $0x18] sm:$0xff]  }
  0x17   :  { %330 = vmatprep.subr.bf16.mxu1 %v400_v0  ;;  %v368_v13 = vld [vmem:[#allocation2 + $0x18] sm:$0xff]  }
  0x19   :  { %319 = vmatpush3.bf16.msra.mxu0 %v358_v2 }
  0x1a   :  { %320 = vmatprep.subr.bf16.mxu0 %v400_v0  ;;  %331 = vmatpush3.bf16.msra.mxu1 %v364_v9 }
  0x1b   :  { %332 = vmatprep.subr.bf16.mxu1 %v400_v0 }
  0x1d   :  { %321 = vmatpush3.bf16.msra.mxu0 %v359_v3 }
  0x1e   :  { %322 = vmatprep.subr.bf16.mxu0 %v400_v0  ;;  %333 = vmatpush3.bf16.msra.mxu1 %v366_v11 }
  0x1f   :  { %334 = vmatprep.subr.bf16.mxu1 %v400_v0 }
  0x21   :  { %323 = vmatpush3.bf16.msra.mxu0 %v360_v4 }
  0x22   :  { %340 = vmatprep.subr.bf16.mxu0 %v400_v0  ;;  %335 = vmatpush3.bf16.msra.mxu1 %v368_v13 }
  0x24   :  { %325 = vmatmul.mubr.msk.bf16.vlgmr.msra.gmra.mrb[0].mxu0 %vm67_vm1, %v34_v5 }
  0x25   :  { %348 = vmatprep.mubr.msk.bf16.mxu0 %vm401_vm0, %v400_v0  ;;  %341 = vmatpush3.bf16.msra.mxu0 %v361_v6 }
  0x26   :  { %342 = vmatprep.subr.bf16.mxu0 %v400_v0 }
  0x29   :  { %343 = vmatpush3.bf16.msra.mxu0 %v363_v8 }
  0x2a   :  { %344 = vmatprep.subr.bf16.mxu0 %v400_v0 }
  0x2d   :  { %345 = vmatpush3.bf16.msra.mxu0 %v365_v10 }
  0x2e   :  { %346 = vmatprep.subr.bf16.mxu0 %v400_v0 }
  0x31   :  { %347 = vmatpush3.bf16.msra.mxu0 %v367_v12 }
  0x34   :  { %349 = vmatmul.mubr.msk.bf16.vlgmr.msra.gmra.mrb[4].mxu0 %vm67_vm1, %v34_v5 }
  0xf7   :  { %v105_v14 = vpop.f32.mrb[0].mxu0 }
  0xf8   :  { %v326_v15 = vpop.f32.mrb[1].mxu0  ;;  %119 = vrot.lane.b32.xlu0 %v105_v14, %s398_s28  ;;  %v290_v18 = vmul.f32 -1.442695, %v105_v14 }
  0xf9   :  { %v108_v16 = vpop.f32.mrb[2].mxu0 }
  0xfa   :  { %v327_v17 = vpop.f32.mrb[3].mxu0  ;;  %369 = vpow2.f32 %v290_v18 }
 0x104   :  { %v370_v19 = vpop.eup %369 }
 0x105   :  { %v114_v20 = vadd.f32 1.0, %v370_v19 }
 0x107   :  { %371 = vrcp.f32 %v114_v20  ;;  %v268_v25 = vpop.f32.mrb[4].mxu0 }
 0x108   :  { %275 = vst.msk [vmem:[%s491_s5] sm:$0xff] %vm274_vm2, %v268_v25  ;;  %v350_v26 = vpop.f32.mrb[5].mxu0 }
 0x109   :  { %v271_v28 = vpop.f32.mrb[6].mxu0 }
 0x10a   :  { %v351_v29 = vpop.f32.mrb[7].mxu0 }
 0x111   :  { %v372_v21 = vpop.eup %371 }
 0x112   :  { %v117_v22 = vmul.f32 %v372_v21, %v105_v14 }
 0x16a   :  { %v120_v23 = vpop.permute.xlu0 %119 }
 0x16b   :  { %v122_v24 = vmul.f32 %v120_v23, %v117_v22 }
 0x16d   :  { %v123_v27 = vpack.c.bf16 %v122_v24, %v122_v24 }
 0x16f   :  { %337 = vmatmul.mubr.msk.bf16.vlgmr.msra.gmra.mrb[0].mxu1 %vm67_vm1, %v123_v27 }
 0x242   :  { %v193_v30 = vpop.f32.mrb[0].mxu1 }
 0x243   :  { %v199_v31 = vpack.c.bf16 %v193_v30, %v193_v30  ;;  %v338_v32 = vpop.f32.mrb[1].mxu1 }
 0x244   :  { %v196_v33 = vpop.f32.mrb[2].mxu1 }
 0x245   :  { %201 = vst.msk [vmem:[%s490_s4] sm:$0xf] %vm200_vm3, %v199_v31  ;;  %v339_v34 = vpop.f32.mrb[3].mxu1 }
 0x246   :  { %284 = vsyncpa [#allocation3], 1 }

// kernel: deepseek_v2_moe_forward.3
= control target key start
LH: loop header
LB: loop body
LE: loop exit
PB: predicated region body
PF: predicated region fallthrough
CT: control target
= control target key end

     0   :  { %s950_s0 = inlined_call_operand.vmem [shape: s32[8], index: 0, kind: input, shape index: {}]   ;;  %s951_s1 = inlined_call_operand.<no memory space> [shape: s32[1], index: 1, kind: input, shape index: {}]   ;;  %s952_s2 = inlined_call_operand.vmem [shape: bf16[8,64], index: 2, kind: input, shape index: {}]   ;;  %s953_s3 = inlined_call_operand.vmem [shape: bf16[8,64], index: 3, kind: input, shape index: {}]   ;;  %s954_s4 = inlined_call_operand.vmem [shape: bf16[8,64,64], index: 4, kind: input, shape index: {}]   ;;  %s955_s5 = inlined_call_operand.vmem [shape: bf16[8,32,64], index: 5, kind: input, shape index: {}]   ;;  %s956_s6 = inlined_call_operand.vmem [shape: f32[8,8,1], index: 6, kind: input, shape index: {}]   ;;  %s957_s7 = inlined_call_operand.hbm [shape: bf16[8,64], index: 7, kind: output, shape index: {}]  }
   0x1   :  { %s12_s26 = sshll.u32 %s950_s0, 4  ;;  %16 = sst [smem:[#allocation5]] %s951_s1  ;;  %s13_s26 = int_to_ptr.vmem [resolvable:$true] %s12_s26 }
   0x2   :  { %s742_s29 = scalar_lea.vmem %s13_s26, 16  ;;  %p747_p1 = scmp.lt.s32.totalorder %s13_s26, %s13_s26 }
   0x3   :  { %p743_p0 = scmp.ne.s32.totalorder %s13_s26, %s742_s29  ;;  %p748_p2 = scmp.lt.s32.totalorder %s742_s29, %s742_s29 }
   0x5   :  { %p749_p3 = por %p748_p2, %p747_p1 }
   0x7   :  { %p750_p4 = pnand %p749_p3, %p743_p0 }
   0x9   :  { %753 = shalt.err (!%p750_p4)  }
   0xa   :  { %s810_s30 = smov [#allocation4]  }
   0xb   :  { %15 = dma.vmem_to_smem %s13_s26, 16, %s810_s30, [#allocation3] }
   0xc   :  { %792 = dma.done.wait [#allocation3], 16 }
   0xd   :  { %793 = vsyncadd [#allocation3], 4294967280 }
   0xe   :  { %18 = sfence }
   0xf   :  { %19 = vsyncpa [#allocation7], 0  ;;  %s862_s8 = smov 0   ;;  %s864_s0 = smov 0  }
  0x10   :  { %s866_s9 = smov 0  }
  0x11 LB: > { %s638_s1 = sadd.s32 4294967295, %s808_s9   ;;  %s34_s10 = sadd.s32 1, %s804_s0  ;;  %s808_s9 = sphi %s866_s9, %s25_s9   ;;  %s804_s0 = sphi %s864_s0, %s960_s0   ;;  %s800_s8 = sphi %s862_s8, %s959_s8  }
  0x12   : > { %p35_p5 = scmp.ge.s32.totalorder %s34_s10, 8  ;;  %p643_p6 = scmp.ge.s32.totalorder %s808_s9, 1 }
  0x13   : > { %p263_p7 = scmp.lt.s32.totalorder %s808_s9, 9 }
  0x14   : > { %s962_s10 = smov (%p35_p5, %s34_s10), 0 }
  0x15   : > { %p264_p8 = pnand %p643_p6, %p263_p7 }
  0x16   : > { %s317_s11 = sld [smem:[#allocation4 + %s800_s8]] (!%p264_p8)  ;;  %p649_p12 = scmp.ne.s32.totalorder (!%p264_p8), %s800_s8, 0 }
  0x17   : > { %267 = sbr.rel (%p264_p8) target bundleno = 648 (0x288), region = 40  ;;  %s324_s12 = sld [smem:[#allocation4 + %s800_s8]] (!%p264_p8) }
  0x18   : > { %s331_s13 = sld [smem:[#allocation4 + %s800_s8]] (!%p264_p8) }
  0x1c   : > { %p318_p9 = scmp.lt.s32.totalorder (!%p264_p8), %s317_s11, 7 }
  0x1d   : > { %p325_p10 = scmp.lt.s32.totalorder (!%p264_p8), %s324_s12, 7 }
  0x1e   : > { %p332_p11 = scmp.lt.s32.totalorder %s331_s13, 7  ;;  %s964_s11 = smov (!%p318_p9, %s317_s11), 7  ;;  %v345_v0 = vld [vmem:[%s952_s2] sm:$0xf] (!%p649_p12)  ;;  %vm347_vm0 = vcmask (!%p649_p12), 523264  }
  0x1f   : > { %s966_s12 = smov (!%p325_p10, %s324_s12), 7  ;;  %s665_s14 = sshll.u32 %s964_s11, 5  ;;  %v346_v1 = vunpack.c.l.bf16 (!%p649_p12), %v345_v0 }
  0x20   : > { %s322_s17 = scalar_lea.vmem %s954_s4, %s665_s14  ;;  %s666_s18 = sshll.u32 %s966_s12, 4 }
  0x21   : > { %s892_s21 = scalar_lea.vmem %s955_s5, %s666_s18  ;;  %s968_s13 = smov (!%p332_p11, %s331_s13), 7  ;;  %348 = vst.msk [vmem:[#allocation2] sm:$0xff] (!%p649_p12), %vm347_vm0, %v346_v1 }
  0x22   : > { %s648_s22 = sshll.u32 %s968_s13, 3  ;;  %344 = sbr.rel (%p649_p12) target bundleno = 41 (0x29), region = 44 }
  0x23   : > { %s897_s25 = scalar_lea.vmem %s956_s6, %s648_s22 }
  0x29 PF: > { %s349_s28 = sld [smem:[#allocation5]] }
  0x2f   : > { %p650_p13 = scmp.ge.s32.totalorder %s800_s8, %s349_s28 }
  0x30   : > { %v732_v2 = vld [vmem:[%s322_s17] sm:$0xff] (!%p650_p13)   ;;  %v811_v3 = vmov (!%p650_p13), 0.0   ;;  %v733_v4 = vld [vmem:[%s322_s17 + $0x8] sm:$0xff] (!%p650_p13)   ;;  %vm812_vm1 = vmmov (!%p650_p13), 0   ;;  %v734_v5 = vld [vmem:[%s322_s17 + $0x10] sm:$0xff] (!%p650_p13)   ;;  %vm387_vm2 = vcmask (!%p650_p13), 523264  }
  0x31   : > { %353 = sbr.rel (%p650_p13) target bundleno = 613 (0x265), region = 48  ;;  %675 = vmatprep.subr.bf16.mxu0 (!%p650_p13), %v811_v3  ;;  %687 = vmatprep.subr.bf16.mxu1 (!%p650_p13), %v811_v3  ;;  %v735_v6 = vld [vmem:[%s322_s17 + $0x18] sm:$0xff] (!%p650_p13)   ;;  %v354_v7 = vld [vmem:[%s953_s3] sm:$0xf] (!%p650_p13)  ;;  %v737_v9 = vld [vmem:[%s892_s21 + $0x8] sm:$0xff] (!%p650_p13)   ;;  %v813_v10 = vmov (!%p650_p13), 0  }
  0x32   : > { %676 = vmatpush3.bf16.msra.mxu0 (!%p650_p13), %v732_v2  ;;  %683 = vmatprep.mubr.msk.bf16.mxu0 (!%p650_p13), %vm812_vm1, %v811_v3  ;;  %v736_v8 = vld [vmem:[%s892_s21] sm:$0xff] (!%p650_p13)   ;;  %s814_s11 = smov (!%p650_p13), 96   ;;  %vm460_vm3 = vcmask (!%p650_p13), 261120  }
  0x33   : > { %677 = vmatprep.subr.bf16.mxu0 (!%p650_p13), %v811_v3  ;;  %691 = vmatprep.mubr.msk.bf16.mxu1 (!%p650_p13), %vm812_vm1, %v811_v3  ;;  %v505_v14 = vld [vmem:[%s897_s25] sm:$0xff] (!%p650_p13) }
  0x34   : > { %688 = vmatpush3.bf16.msra.mxu1 (!%p650_p13), %v736_v8  ;;  %731 = vset.pattern.permute.xlu0 (!%p650_p13), %v813_v10  ;;  %v504_v26 = vld [vmem:[#allocation2] sm:$0xff] (!%p650_p13) }
  0x35   : > { %689 = vmatprep.subr.bf16.mxu1 (!%p650_p13), %v811_v3 }
  0x36   : > { %678 = vmatpush3.bf16.msra.mxu0 (!%p650_p13), %v733_v4 }
  0x37   : > { %679 = vmatprep.subr.bf16.mxu0 (!%p650_p13), %v811_v3 }
  0x38   : > { %690 = vmatpush3.bf16.msra.mxu1 %v737_v9 }
  0x3a   : > { %680 = vmatpush3.bf16.msra.mxu0 %v734_v5 }
  0x3b   : > { %681 = vmatprep.subr.bf16.mxu0 %v811_v3 }
  0x3e   : > { %682 = vmatpush3.bf16.msra.mxu0 %v735_v6 }
  0x41   : > { %684 = vmatmul.mubr.msk.bf16.vlgmr.msra.gmra.mrb[0].mxu0 %vm387_vm2, %v354_v7 }
 0x114   : > { %v425_v11 = vpop.f32.mrb[0].mxu0 }
 0x115   : > { %439 = vrot.lane.b32.xlu0 %v425_v11, %s814_s11  ;;  %v685_v12 = vpop.f32.mrb[1].mxu0  ;;  %v656_v16 = vmul.f32 -1.442695, %v425_v11 }
 0x116   : > { %v428_v13 = vpop.f32.mrb[2].mxu0 }
 0x117   : > { %v686_v15 = vpop.f32.mrb[3].mxu0  ;;  %738 = vpow2.f32 %v656_v16 }
 0x119   : > { %508 = vperm.xlu0 %731, %v505_v14  }
 0x121   : > { %v739_v17 = vpop.eup %738 }
 0x122   : > { %v434_v18 = vadd.f32 1.0, %v739_v17 }
 0x124   : > { %740 = vrcp.f32 %v434_v18 }
 0x12e   : > { %v741_v19 = vpop.eup %740 }
 0x12f   : > { %v437_v20 = vmul.f32 %v741_v19, %v425_v11 }
 0x187   : > { %v440_v21 = vpop.permute.xlu0 %439 }
 0x188   : > { %v442_v22 = vmul.f32 %v440_v21, %v437_v20 }
 0x18a   : > { %v443_v23 = vpack.c.bf16 %v442_v22, %v442_v22 }
 0x18c   : > { %692 = vmatmul.mubr.msk.bf16.vlgmr.msra.gmra.mrb[0].mxu1 %vm460_vm3, %v443_v23 }
 0x198   : > { %v509_v24 = vpop.permute.xlu0 %508 }
 0x25f   : > { %v498_v25 = vpop.f32.mrb[0].mxu1 }
 0x260   : > { %v511_v27 = vmul.f32 %v509_v24, %v498_v25  ;;  %v693_v28 = vpop.f32.mrb[1].mxu1 }
 0x261   : > { %v501_v29 = vpop.f32.mrb[2].mxu1 }
 0x262   : > { %v512_v30 = vadd.f32 %v511_v27, %v504_v26  ;;  %v694_v31 = vpop.f32.mrb[3].mxu1 }
 0x264   : > { %513 = vst.msk [vmem:[#allocation2] sm:$0xff] %vm387_vm2, %v512_v30 }
 0x265 PF: > { %p660_p0 = scmp.ne.s32.totalorder %s800_s8, 7 }
 0x266   : > { %vm520_vm4 = vcmask (!%p660_p0), 519168  }
 0x267   : > { %517 = sbr.rel (%p660_p0) target bundleno = 623 (0x26f), region = 52 }
 0x26b   : > { %v518_v32 = vld [vmem:[#allocation2] sm:$0xff] (!%p660_p0) }
 0x26c   : > { %v519_v33 = vpack.c.bf16 (!%p660_p0), %v518_v32, %v518_v32 }
 0x26e   : > { %521 = vst.msk [vmem:[#allocation6] sm:$0xf] %vm520_vm4, %v519_v33 }
 0x26f PF: > { %p915_p1 = scmp.eq.s32.totalorder %s638_s1, 7  ;;  %s815_s13 = smov [#allocation6]  }
 0x270   : > { %s531_s14 = sshll.u32 %s815_s13, 4  ;;  %s532_s14 = int_to_ptr.vmem [resolvable:$true] %s531_s14 }
 0x271   : > { %s754_s15 = scalar_lea.vmem %s532_s14, 64  ;;  %p761_p5 = scmp.lt.s32.totalorder %s532_s14, %s532_s14 }
 0x272   : > { %p755_p2 = scmp.ne.s32.totalorder %s532_s14, %s754_s15  ;;  %p762_p6 = scmp.lt.s32.totalorder %s754_s15, %s754_s15 }
 0x274   : > { %p756_p3 = pnand %p755_p2, %p915_p1  ;;  %p763_p7 = por %p762_p6, %p761_p5 }
 0x276   : > { %p757_p4 = pneg %p756_p3 }
 0x278   : > { %p764_p8 = pnand %p763_p7, %p757_p4 }
 0x27a   : > { %767 = shalt.err (!%p764_p8)
}
 0x27b   : > { %s768_s1 = scalar_lea.hbm %s957_s7, 64 }
 0x27c   : > { %p769_p9 = scmp.ne.s32.totalorder %s957_s7, %s768_s1  ;;  %p774_p12 = scmp.lt.u32.totalorder %s768_s1, %s957_s7 }
 0x27e   : > { %p770_p10 = pnand %p769_p9, %p915_p1 }
 0x280   : > { %p771_p11 = pneg %p770_p10 }
 0x282   : > { %p776_p13 = pnand %p774_p12, %p771_p11 }
 0x284   : > { %779 = shalt.err (!%p776_p13)
}
 0x285   : > { %696 = dma.vmem_to_hbm [thread:$0]  (%p915_p1), %s532_s14, 64, %s957_s7, [#allocation7]  }
 0x286   : > { %795 = dma.done.wait (%p915_p1), [#allocation7], 64  }
 0x287   : > { %797 = vsyncadd (%p915_p1), [#allocation7], 4294967232 }
 0x288 PF: > { %s25_s9 = sadd.s32 1, %s808_s9   ;;  %s959_s8 = smov %s804_s0 }
 0x289   : > { %p22_p0 = scmp.ge.s32.totalorder %s25_s9, 10   ;;  %s960_s0 = smov %s962_s10 }
 0x28b   :  { %24 = sbr.rel (!%p22_p0) target bundleno = 17 (0x11), region = 92 }
 0x292   :  { %544 = vsyncpa [#allocation7], 1 }
 0x293   :  { %546 = vsyncpa [#allocation7 + $0x1], 1 }

</bundles_post_ra>
